<compile_context>
chip_gen: v6e
topology: v6e:2x2x1
jax: 0.10.0
libtpu: 0.0.40
codegen_flags: <defaults>
</compile_context>

<pallas_src>
import jax
import jax.numpy as jnp
from jax.experimental import pallas as pl
from jax.experimental.pallas import tpu as pltpu

LANE = 128
SUBLANE = 8


def _round_up(x, m):
    return ((x + m - 1) // m) * m


# ---------------------------------------------------------------------------
# in-kernel math
# ---------------------------------------------------------------------------
def _g(tz, u, a):
    """Ladder combinator.  a is the (10, D) stack of a1..a10; each (1, D) row
    broadcasts over the batch (equivalent to ones.mm(a_i) in the PyTorch code)."""
    a1, a2, a3, a4, a5 = a[0:1], a[1:2], a[2:3], a[3:4], a[4:5]
    a6, a7, a8, a9, a10 = a[5:6], a[6:7], a[7:8], a[8:9], a[9:10]
    mu = a1 * jax.nn.sigmoid(a2 * u + a3) + a4 * u + a5
    v = a6 * jax.nn.sigmoid(a7 * u + a8) + a9 * u + a10
    return (tz - mu) * v + mu


def fused_decoder_kernel(top_ref, tz_ref, a_ref, w_ref, b_ref, hatz_ref):
    """Entire decoder stack in one kernel.

    top_ref  : (Bp, Dp)        initial top activation
    tz_ref   : (L+1, Bp, Dp)   tilde_z per layer (incl. bottom decoder)
    a_ref    : (L+1, 10, Dp)   combinator params per layer
    w_ref    : (L, Dp, Dp)     pre-transposed Linear weights (padded)
    b_ref    : (L, 1, Dp)      biases (padded)
    hatz_ref : (L+1, Bp, Dp)   per-layer hat_z outputs
    """
    L = w_ref.shape[0]
    top = top_ref[...]                      # carried across the unrolled layer loop
    for i in range(L):                      # static Python unroll (L is small)
        hz = _g(tz_ref[i], top, a_ref[i])
        hatz_ref[i] = hz                    # lane-dense (Bp, 128) store
        top = jnp.dot(hz, w_ref[i], preferred_element_type=jnp.float32) + b_ref[i]
    hatz_ref[L] = _g(tz_ref[L], top, a_ref[L])   # bottom decoder: g() only


# ---------------------------------------------------------------------------
# pallas_call wrapper (single launch, full-array blocks, jitted)
# ---------------------------------------------------------------------------
def _full_spec(shape):
    return pl.BlockSpec(shape, lambda: (0,) * len(shape))


def _pad2(x, rows, cols):
    return jnp.pad(x, ((0, rows - x.shape[0]), (0, cols - x.shape[1])))


@jax.jit
def decoder_forward(params, bottom_a, tilde_z_states, top):
    """Mirrors Decoder.forward: returns the list of hat_z (one per stacked
    layer plus the bottom decoder)."""
    L = len(params)                                    # number of projection layers
    B = top.shape[0]
    feat_dims = [tz.shape[1] for tz in tilde_z_states]
    Bp = _round_up(B, SUBLANE)
    Dp = _round_up(max(feat_dims + [top.shape[1]]), LANE)

    tz_stack = jnp.stack([_pad2(tz, Bp, Dp) for tz in tilde_z_states])
    a_stack = jnp.stack([_pad2(p["a"], 10, Dp) for p in params]
                        + [_pad2(bottom_a, 10, Dp)])
    w_stack = jnp.stack([_pad2(p["w_t"], Dp, Dp) for p in params])
    b_stack = jnp.stack([_pad2(p["b"], 1, Dp) for p in params])
    top_p = _pad2(top, Bp, Dp)

    hatz_stack = pl.pallas_call(
        fused_decoder_kernel,
        out_shape=jax.ShapeDtypeStruct((L + 1, Bp, Dp), jnp.float32),
        in_specs=[
            _full_spec(top_p.shape),
            _full_spec(tz_stack.shape),
            _full_spec(a_stack.shape),
            _full_spec(w_stack.shape),
            _full_spec(b_stack.shape),
        ],
        out_specs=_full_spec((L + 1, Bp, Dp)),
        compiler_params=pltpu.CompilerParams(vmem_limit_bytes=64 * 1024 * 1024),
    )(top_p, tz_stack, a_stack, w_stack, b_stack)

    # TODO(synk): at production sizes (large hidden_dims / n_layers) stream the
    # per-layer weights with a grid over the layer axis instead of holding the
    # full padded weight stack resident (v7x has only 64 MiB VMEM).
    return [hatz_stack[i, :B, :d] for i, d in enumerate(feat_dims)]


# ---------------------------------------------------------------------------
# Decoder: parameter construction + pure-JAX reference
# ---------------------------------------------------------------------------
def init_decoder_params(key, d_in, hidden_dims, d_out, n_layers, bias=True):
    """Deterministic synthetic init.  Layer dims mirror the PyTorch __init__:
    layer_0: (d_in -> hidden), layers 1..n_layers-1: (hidden -> hidden),
    layer_n_layers: (hidden -> d_out), bottom: (d_out -> None)."""
    dims = [(d_in, hidden_dims)]
    dims += [(hidden_dims, hidden_dims) for _ in range(n_layers - 1)]
    dims += [(hidden_dims, d_out)]

    params = []
    for (di, do) in dims:
        key, ka, kw = jax.random.split(key, 3)
        a = 0.1 * jax.random.normal(ka, (10, di), dtype=jnp.float32)
        bound = (6.0 / (di + do)) ** 0.5  # xavier_uniform
        w = jax.random.uniform(kw, (do, di), jnp.float32, -bound, bound)
        b = (jnp.full((1, do), 0.01, jnp.float32) if bias
             else jnp.zeros((1, do), jnp.float32))
        params.append({"a": a, "w_t": w.T, "b": b})

    key, ka = jax.random.split(key)
    bottom_a = 0.1 * jax.random.normal(ka, (10, d_out), dtype=jnp.float32)
    return params, bottom_a


def _ref_forward(params, bottom_a, tilde_z_states, top):
    hat_z = []
    for i, p in enumerate(params):
        hz = _g(tilde_z_states[i], top, p["a"])
        hat_z.append(hz)
        top = hz @ p["w_t"] + p["b"]
    hat_z.append(_g(tilde_z_states[-1], top, bottom_a))
    return hat_z


if __name__ == "__main__":
    B, D_IN, HIDDEN, D_OUT, N_LAYERS = 8, 32, 32, 16, 2

    key = jax.random.PRNGKey(0)
    key, kp = jax.random.split(key)
    params, bottom_a = init_decoder_params(kp, D_IN, HIDDEN, D_OUT, N_LAYERS, bias=True)

    # tilde_z_states: one per stacked layer (+1 for the bottom decoder)
    state_dims = [D_IN] + [HIDDEN] * N_LAYERS + [D_OUT]
    tilde_z_states = []
    for d in state_dims:
        key, ks = jax.random.split(key)
        tilde_z_states.append(jax.random.normal(ks, (B, d), dtype=jnp.float32))
    key, kt = jax.random.split(key)
    top = jax.random.normal(kt, (B, D_IN), dtype=jnp.float32)

    hat_z = decoder_forward(params, bottom_a, tilde_z_states, top)
    hat_z = [jax.block_until_ready(h) for h in hat_z]

    ref = _ref_forward(params, bottom_a, tilde_z_states, top)
    for h, r in zip(hat_z, ref):
        assert h.shape == r.shape, (h.shape, r.shape)
        assert jnp.allclose(h, r, atol=1e-5, rtol=1e-5)

    print("KERNEL_OK")
</pallas_src>

<mosaic_0001>
module attributes {stable_mosaic.version = 11 : i64} {
  func.func @fused_decoder_kernel(%arg0: memref<8x128xf32, #tpu.memory_space<vmem>>, %arg1: memref<4x8x128xf32, #tpu.memory_space<vmem>>, %arg2: memref<4x10x128xf32, #tpu.memory_space<vmem>>, %arg3: memref<3x128x128xf32, #tpu.memory_space<vmem>>, %arg4: memref<3x1x128xf32, #tpu.memory_space<vmem>>, %arg5: memref<4x8x128xf32, #tpu.memory_space<vmem>>) attributes {dimension_semantics = [], scalar_prefetch = 0 : i64, scratch_operands = 0 : i64, tpu.core_type = #tpu.core_type<tc>} {
    %c0 = arith.constant 0 : index
    %c0_0 = arith.constant 0 : index
    %0 = vector.load %arg0[%c0, %c0_0] : memref<8x128xf32, #tpu.memory_space<vmem>>, vector<8x128xf32>
    %c0_1 = arith.constant 0 : index
    %c0_2 = arith.constant 0 : index
    %c0_3 = arith.constant 0 : index
    %1 = vector.load %arg1[%c0_1, %c0_2, %c0_3] : memref<4x8x128xf32, #tpu.memory_space<vmem>>, vector<1x8x128xf32>
    %2 = vector.shape_cast %1 : vector<1x8x128xf32> to vector<8x128xf32>
    %c0_4 = arith.constant 0 : index
    %c0_5 = arith.constant 0 : index
    %c0_6 = arith.constant 0 : index
    %3 = vector.load %arg2[%c0_4, %c0_5, %c0_6] : memref<4x10x128xf32, #tpu.memory_space<vmem>>, vector<1x10x128xf32>
    %4 = vector.shape_cast %3 : vector<1x10x128xf32> to vector<10x128xf32>
    %5 = vector.extract_strided_slice %4 {offsets = [0, 0], sizes = [1, 128], strides = [1, 1]} : vector<10x128xf32> to vector<1x128xf32>
    %6 = vector.extract_strided_slice %4 {offsets = [1, 0], sizes = [1, 128], strides = [1, 1]} : vector<10x128xf32> to vector<1x128xf32>
    %7 = vector.extract_strided_slice %4 {offsets = [2, 0], sizes = [1, 128], strides = [1, 1]} : vector<10x128xf32> to vector<1x128xf32>
    %8 = vector.extract_strided_slice %4 {offsets = [3, 0], sizes = [1, 128], strides = [1, 1]} : vector<10x128xf32> to vector<1x128xf32>
    %9 = vector.extract_strided_slice %4 {offsets = [4, 0], sizes = [1, 128], strides = [1, 1]} : vector<10x128xf32> to vector<1x128xf32>
    %10 = vector.extract_strided_slice %4 {offsets = [5, 0], sizes = [1, 128], strides = [1, 1]} : vector<10x128xf32> to vector<1x128xf32>
    %11 = vector.extract_strided_slice %4 {offsets = [6, 0], sizes = [1, 128], strides = [1, 1]} : vector<10x128xf32> to vector<1x128xf32>
    %12 = vector.extract_strided_slice %4 {offsets = [7, 0], sizes = [1, 128], strides = [1, 1]} : vector<10x128xf32> to vector<1x128xf32>
    %13 = vector.extract_strided_slice %4 {offsets = [8, 0], sizes = [1, 128], strides = [1, 1]} : vector<10x128xf32> to vector<1x128xf32>
    %14 = vector.extract_strided_slice %4 {offsets = [9, 0], sizes = [1, 128], strides = [1, 1]} : vector<10x128xf32> to vector<1x128xf32>
    %15 = vector.broadcast %6 : vector<1x128xf32> to vector<8x128xf32>
    %16 = arith.mulf %15, %0 : vector<8x128xf32>
    %17 = vector.broadcast %7 : vector<1x128xf32> to vector<8x128xf32>
    %18 = arith.addf %16, %17 : vector<8x128xf32>
    %19 = arith.negf %18 : vector<8x128xf32>
    %20 = math.exp %19 : vector<8x128xf32>
    %cst = arith.constant 1.000000e+00 : f32
    %21 = vector.broadcast %cst : f32 to vector<8x128xf32>
    %22 = arith.addf %21, %20 : vector<8x128xf32>
    %23 = arith.divf %21, %22 : vector<8x128xf32>
    %24 = vector.broadcast %5 : vector<1x128xf32> to vector<8x128xf32>
    %25 = arith.mulf %24, %23 : vector<8x128xf32>
    %26 = vector.broadcast %8 : vector<1x128xf32> to vector<8x128xf32>
    %27 = arith.mulf %26, %0 : vector<8x128xf32>
    %28 = arith.addf %25, %27 : vector<8x128xf32>
    %29 = vector.broadcast %9 : vector<1x128xf32> to vector<8x128xf32>
    %30 = arith.addf %28, %29 : vector<8x128xf32>
    %31 = vector.broadcast %11 : vector<1x128xf32> to vector<8x128xf32>
    %32 = arith.mulf %31, %0 : vector<8x128xf32>
    %33 = vector.broadcast %12 : vector<1x128xf32> to vector<8x128xf32>
    %34 = arith.addf %32, %33 : vector<8x128xf32>
    %35 = arith.negf %34 : vector<8x128xf32>
    %36 = math.exp %35 : vector<8x128xf32>
    %cst_7 = arith.constant 1.000000e+00 : f32
    %37 = vector.broadcast %cst_7 : f32 to vector<8x128xf32>
    %38 = arith.addf %37, %36 : vector<8x128xf32>
    %39 = arith.divf %37, %38 : vector<8x128xf32>
    %40 = vector.broadcast %10 : vector<1x128xf32> to vector<8x128xf32>
    %41 = arith.mulf %40, %39 : vector<8x128xf32>
    %42 = vector.broadcast %13 : vector<1x128xf32> to vector<8x128xf32>
    %43 = arith.mulf %42, %0 : vector<8x128xf32>
    %44 = arith.addf %41, %43 : vector<8x128xf32>
    %45 = vector.broadcast %14 : vector<1x128xf32> to vector<8x128xf32>
    %46 = arith.addf %44, %45 : vector<8x128xf32>
    %47 = arith.subf %2, %30 : vector<8x128xf32>
    %48 = arith.mulf %47, %46 : vector<8x128xf32>
    %49 = arith.addf %48, %30 : vector<8x128xf32>
    %c0_8 = arith.constant 0 : index
    %c0_9 = arith.constant 0 : index
    %c0_10 = arith.constant 0 : index
    %50 = vector.load %arg5[%c0_8, %c0_9, %c0_10] : memref<4x8x128xf32, #tpu.memory_space<vmem>>, vector<1x8x128xf32>
    %51 = vector.shape_cast %50 : vector<1x8x128xf32> to vector<8x128xf32>
    %52 = vector.shape_cast %49 : vector<8x128xf32> to vector<1x8x128xf32>
    tpu.vector_store %arg5[%c0_8, %c0_9, %c0_10], %52 {strides = array<i32>} : memref<4x8x128xf32, #tpu.memory_space<vmem>>, vector<1x8x128xf32>,
    %c0_11 = arith.constant 0 : index
    %c0_12 = arith.constant 0 : index
    %c0_13 = arith.constant 0 : index
    %53 = vector.load %arg3[%c0_11, %c0_12, %c0_13] : memref<3x128x128xf32, #tpu.memory_space<vmem>>, vector<1x128x128xf32>
    %54 = vector.shape_cast %53 : vector<1x128x128xf32> to vector<128x128xf32>
    %cst_14 = arith.constant dense<0.000000e+00> : vector<8x128xf32>
    %55 = tpu.matmul %49, %54, %cst_14 {dimension_numbers = #tpu.dot_dimension_numbers<[1], [0], [0], [1], [0, 0, 1, 1], [], []>} : vector<8x128xf32>, vector<128x128xf32>, vector<8x128xf32> -> vector<8x128xf32>
    %c0_15 = arith.constant 0 : index
    %c0_16 = arith.constant 0 : index
    %c0_17 = arith.constant 0 : index
    %56 = vector.load %arg4[%c0_15, %c0_16, %c0_17] : memref<3x1x128xf32, #tpu.memory_space<vmem>>, vector<1x1x128xf32>
    %57 = vector.shape_cast %56 : vector<1x1x128xf32> to vector<1x128xf32>
    %58 = vector.broadcast %57 : vector<1x128xf32> to vector<8x128xf32>
    %59 = arith.addf %55, %58 : vector<8x128xf32>
    %c1 = arith.constant 1 : index
    %c0_18 = arith.constant 0 : index
    %c0_19 = arith.constant 0 : index
    %60 = vector.load %arg1[%c1, %c0_18, %c0_19] : memref<4x8x128xf32, #tpu.memory_space<vmem>>, vector<1x8x128xf32>
    %61 = vector.shape_cast %60 : vector<1x8x128xf32> to vector<8x128xf32>
    %c1_20 = arith.constant 1 : index
    %c0_21 = arith.constant 0 : index
    %c0_22 = arith.constant 0 : index
    %62 = vector.load %arg2[%c1_20, %c0_21, %c0_22] : memref<4x10x128xf32, #tpu.memory_space<vmem>>, vector<1x10x128xf32>
    %63 = vector.shape_cast %62 : vector<1x10x128xf32> to vector<10x128xf32>
    %64 = vector.extract_strided_slice %63 {offsets = [0, 0], sizes = [1, 128], strides = [1, 1]} : vector<10x128xf32> to vector<1x128xf32>
    %65 = vector.extract_strided_slice %63 {offsets = [1, 0], sizes = [1, 128], strides = [1, 1]} : vector<10x128xf32> to vector<1x128xf32>
    %66 = vector.extract_strided_slice %63 {offsets = [2, 0], sizes = [1, 128], strides = [1, 1]} : vector<10x128xf32> to vector<1x128xf32>
    %67 = vector.extract_strided_slice %63 {offsets = [3, 0], sizes = [1, 128], strides = [1, 1]} : vector<10x128xf32> to vector<1x128xf32>
    %68 = vector.extract_strided_slice %63 {offsets = [4, 0], sizes = [1, 128], strides = [1, 1]} : vector<10x128xf32> to vector<1x128xf32>
    %69 = vector.extract_strided_slice %63 {offsets = [5, 0], sizes = [1, 128], strides = [1, 1]} : vector<10x128xf32> to vector<1x128xf32>
    %70 = vector.extract_strided_slice %63 {offsets = [6, 0], sizes = [1, 128], strides = [1, 1]} : vector<10x128xf32> to vector<1x128xf32>
    %71 = vector.extract_strided_slice %63 {offsets = [7, 0], sizes = [1, 128], strides = [1, 1]} : vector<10x128xf32> to vector<1x128xf32>
    %72 = vector.extract_strided_slice %63 {offsets = [8, 0], sizes = [1, 128], strides = [1, 1]} : vector<10x128xf32> to vector<1x128xf32>
    %73 = vector.extract_strided_slice %63 {offsets = [9, 0], sizes = [1, 128], strides = [1, 1]} : vector<10x128xf32> to vector<1x128xf32>
    %74 = vector.broadcast %65 : vector<1x128xf32> to vector<8x128xf32>
    %75 = arith.mulf %74, %59 : vector<8x128xf32>
    %76 = vector.broadcast %66 : vector<1x128xf32> to vector<8x128xf32>
    %77 = arith.addf %75, %76 : vector<8x128xf32>
    %78 = arith.negf %77 : vector<8x128xf32>
    %79 = math.exp %78 : vector<8x128xf32>
    %cst_23 = arith.constant 1.000000e+00 : f32
    %80 = vector.broadcast %cst_23 : f32 to vector<8x128xf32>
    %81 = arith.addf %80, %79 : vector<8x128xf32>
    %82 = arith.divf %80, %81 : vector<8x128xf32>
    %83 = vector.broadcast %64 : vector<1x128xf32> to vector<8x128xf32>
    %84 = arith.mulf %83, %82 : vector<8x128xf32>
    %85 = vector.broadcast %67 : vector<1x128xf32> to vector<8x128xf32>
    %86 = arith.mulf %85, %59 : vector<8x128xf32>
    %87 = arith.addf %84, %86 : vector<8x128xf32>
    %88 = vector.broadcast %68 : vector<1x128xf32> to vector<8x128xf32>
    %89 = arith.addf %87, %88 : vector<8x128xf32>
    %90 = vector.broadcast %70 : vector<1x128xf32> to vector<8x128xf32>
    %91 = arith.mulf %90, %59 : vector<8x128xf32>
    %92 = vector.broadcast %71 : vector<1x128xf32> to vector<8x128xf32>
    %93 = arith.addf %91, %92 : vector<8x128xf32>
    %94 = arith.negf %93 : vector<8x128xf32>
    %95 = math.exp %94 : vector<8x128xf32>
    %cst_24 = arith.constant 1.000000e+00 : f32
    %96 = vector.broadcast %cst_24 : f32 to vector<8x128xf32>
    %97 = arith.addf %96, %95 : vector<8x128xf32>
    %98 = arith.divf %96, %97 : vector<8x128xf32>
    %99 = vector.broadcast %69 : vector<1x128xf32> to vector<8x128xf32>
    %100 = arith.mulf %99, %98 : vector<8x128xf32>
    %101 = vector.broadcast %72 : vector<1x128xf32> to vector<8x128xf32>
    %102 = arith.mulf %101, %59 : vector<8x128xf32>
    %103 = arith.addf %100, %102 : vector<8x128xf32>
    %104 = vector.broadcast %73 : vector<1x128xf32> to vector<8x128xf32>
    %105 = arith.addf %103, %104 : vector<8x128xf32>
    %106 = arith.subf %61, %89 : vector<8x128xf32>
    %107 = arith.mulf %106, %105 : vector<8x128xf32>
    %108 = arith.addf %107, %89 : vector<8x128xf32>
    %c1_25 = arith.constant 1 : index
    %c0_26 = arith.constant 0 : index
    %c0_27 = arith.constant 0 : index
    %109 = vector.load %arg5[%c1_25, %c0_26, %c0_27] : memref<4x8x128xf32, #tpu.memory_space<vmem>>, vector<1x8x128xf32>
    %110 = vector.shape_cast %109 : vector<1x8x128xf32> to vector<8x128xf32>
    %111 = vector.shape_cast %108 : vector<8x128xf32> to vector<1x8x128xf32>
    tpu.vector_store %arg5[%c1_25, %c0_26, %c0_27], %111 {strides = array<i32>} : memref<4x8x128xf32, #tpu.memory_space<vmem>>, vector<1x8x128xf32>,
    %c1_28 = arith.constant 1 : index
    %c0_29 = arith.constant 0 : index
    %c0_30 = arith.constant 0 : index
    %112 = vector.load %arg3[%c1_28, %c0_29, %c0_30] : memref<3x128x128xf32, #tpu.memory_space<vmem>>, vector<1x128x128xf32>
    %113 = vector.shape_cast %112 : vector<1x128x128xf32> to vector<128x128xf32>
    %cst_31 = arith.constant dense<0.000000e+00> : vector<8x128xf32>
    %114 = tpu.matmul %108, %113, %cst_31 {dimension_numbers = #tpu.dot_dimension_numbers<[1], [0], [0], [1], [0, 0, 1, 1], [], []>} : vector<8x128xf32>, vector<128x128xf32>, vector<8x128xf32> -> vector<8x128xf32>
    %c1_32 = arith.constant 1 : index
    %c0_33 = arith.constant 0 : index
    %c0_34 = arith.constant 0 : index
    %115 = vector.load %arg4[%c1_32, %c0_33, %c0_34] : memref<3x1x128xf32, #tpu.memory_space<vmem>>, vector<1x1x128xf32>
    %116 = vector.shape_cast %115 : vector<1x1x128xf32> to vector<1x128xf32>
    %117 = vector.broadcast %116 : vector<1x128xf32> to vector<8x128xf32>
    %118 = arith.addf %114, %117 : vector<8x128xf32>
    %c2 = arith.constant 2 : index
    %c0_35 = arith.constant 0 : index
    %c0_36 = arith.constant 0 : index
    %119 = vector.load %arg1[%c2, %c0_35, %c0_36] : memref<4x8x128xf32, #tpu.memory_space<vmem>>, vector<1x8x128xf32>
    %120 = vector.shape_cast %119 : vector<1x8x128xf32> to vector<8x128xf32>
    %c2_37 = arith.constant 2 : index
    %c0_38 = arith.constant 0 : index
    %c0_39 = arith.constant 0 : index
    %121 = vector.load %arg2[%c2_37, %c0_38, %c0_39] : memref<4x10x128xf32, #tpu.memory_space<vmem>>, vector<1x10x128xf32>
    %122 = vector.shape_cast %121 : vector<1x10x128xf32> to vector<10x128xf32>
    %123 = vector.extract_strided_slice %122 {offsets = [0, 0], sizes = [1, 128], strides = [1, 1]} : vector<10x128xf32> to vector<1x128xf32>
    %124 = vector.extract_strided_slice %122 {offsets = [1, 0], sizes = [1, 128], strides = [1, 1]} : vector<10x128xf32> to vector<1x128xf32>
    %125 = vector.extract_strided_slice %122 {offsets = [2, 0], sizes = [1, 128], strides = [1, 1]} : vector<10x128xf32> to vector<1x128xf32>
    %126 = vector.extract_strided_slice %122 {offsets = [3, 0], sizes = [1, 128], strides = [1, 1]} : vector<10x128xf32> to vector<1x128xf32>
    %127 = vector.extract_strided_slice %122 {offsets = [4, 0], sizes = [1, 128], strides = [1, 1]} : vector<10x128xf32> to vector<1x128xf32>
    %128 = vector.extract_strided_slice %122 {offsets = [5, 0], sizes = [1, 128], strides = [1, 1]} : vector<10x128xf32> to vector<1x128xf32>
    %129 = vector.extract_strided_slice %122 {offsets = [6, 0], sizes = [1, 128], strides = [1, 1]} : vector<10x128xf32> to vector<1x128xf32>
    %130 = vector.extract_strided_slice %122 {offsets = [7, 0], sizes = [1, 128], strides = [1, 1]} : vector<10x128xf32> to vector<1x128xf32>
    %131 = vector.extract_strided_slice %122 {offsets = [8, 0], sizes = [1, 128], strides = [1, 1]} : vector<10x128xf32> to vector<1x128xf32>
    %132 = vector.extract_strided_slice %122 {offsets = [9, 0], sizes = [1, 128], strides = [1, 1]} : vector<10x128xf32> to vector<1x128xf32>
    %133 = vector.broadcast %124 : vector<1x128xf32> to vector<8x128xf32>
    %134 = arith.mulf %133, %118 : vector<8x128xf32>
    %135 = vector.broadcast %125 : vector<1x128xf32> to vector<8x128xf32>
    %136 = arith.addf %134, %135 : vector<8x128xf32>
    %137 = arith.negf %136 : vector<8x128xf32>
    %138 = math.exp %137 : vector<8x128xf32>
    %cst_40 = arith.constant 1.000000e+00 : f32
    %139 = vector.broadcast %cst_40 : f32 to vector<8x128xf32>
    %140 = arith.addf %139, %138 : vector<8x128xf32>
    %141 = arith.divf %139, %140 : vector<8x128xf32>
    %142 = vector.broadcast %123 : vector<1x128xf32> to vector<8x128xf32>
    %143 = arith.mulf %142, %141 : vector<8x128xf32>
    %144 = vector.broadcast %126 : vector<1x128xf32> to vector<8x128xf32>
    %145 = arith.mulf %144, %118 : vector<8x128xf32>
    %146 = arith.addf %143, %145 : vector<8x128xf32>
    %147 = vector.broadcast %127 : vector<1x128xf32> to vector<8x128xf32>
    %148 = arith.addf %146, %147 : vector<8x128xf32>
    %149 = vector.broadcast %129 : vector<1x128xf32> to vector<8x128xf32>
    %150 = arith.mulf %149, %118 : vector<8x128xf32>
    %151 = vector.broadcast %130 : vector<1x128xf32> to vector<8x128xf32>
    %152 = arith.addf %150, %151 : vector<8x128xf32>
    %153 = arith.negf %152 : vector<8x128xf32>
    %154 = math.exp %153 : vector<8x128xf32>
    %cst_41 = arith.constant 1.000000e+00 : f32
    %155 = vector.broadcast %cst_41 : f32 to vector<8x128xf32>
    %156 = arith.addf %155, %154 : vector<8x128xf32>
    %157 = arith.divf %155, %156 : vector<8x128xf32>
    %158 = vector.broadcast %128 : vector<1x128xf32> to vector<8x128xf32>
    %159 = arith.mulf %158, %157 : vector<8x128xf32>
    %160 = vector.broadcast %131 : vector<1x128xf32> to vector<8x128xf32>
    %161 = arith.mulf %160, %118 : vector<8x128xf32>
    %162 = arith.addf %159, %161 : vector<8x128xf32>
    %163 = vector.broadcast %132 : vector<1x128xf32> to vector<8x128xf32>
    %164 = arith.addf %162, %163 : vector<8x128xf32>
    %165 = arith.subf %120, %148 : vector<8x128xf32>
    %166 = arith.mulf %165, %164 : vector<8x128xf32>
    %167 = arith.addf %166, %148 : vector<8x128xf32>
    %c2_42 = arith.constant 2 : index
    %c0_43 = arith.constant 0 : index
    %c0_44 = arith.constant 0 : index
    %168 = vector.load %arg5[%c2_42, %c0_43, %c0_44] : memref<4x8x128xf32, #tpu.memory_space<vmem>>, vector<1x8x128xf32>
    %169 = vector.shape_cast %168 : vector<1x8x128xf32> to vector<8x128xf32>
    %170 = vector.shape_cast %167 : vector<8x128xf32> to vector<1x8x128xf32>
    tpu.vector_store %arg5[%c2_42, %c0_43, %c0_44], %170 {strides = array<i32>} : memref<4x8x128xf32, #tpu.memory_space<vmem>>, vector<1x8x128xf32>,
    %c2_45 = arith.constant 2 : index
    %c0_46 = arith.constant 0 : index
    %c0_47 = arith.constant 0 : index
    %171 = vector.load %arg3[%c2_45, %c0_46, %c0_47] : memref<3x128x128xf32, #tpu.memory_space<vmem>>, vector<1x128x128xf32>
    %172 = vector.shape_cast %171 : vector<1x128x128xf32> to vector<128x128xf32>
    %cst_48 = arith.constant dense<0.000000e+00> : vector<8x128xf32>
    %173 = tpu.matmul %167, %172, %cst_48 {dimension_numbers = #tpu.dot_dimension_numbers<[1], [0], [0], [1], [0, 0, 1, 1], [], []>} : vector<8x128xf32>, vector<128x128xf32>, vector<8x128xf32> -> vector<8x128xf32>
    %c2_49 = arith.constant 2 : index
    %c0_50 = arith.constant 0 : index
    %c0_51 = arith.constant 0 : index
    %174 = vector.load %arg4[%c2_49, %c0_50, %c0_51] : memref<3x1x128xf32, #tpu.memory_space<vmem>>, vector<1x1x128xf32>
    %175 = vector.shape_cast %174 : vector<1x1x128xf32> to vector<1x128xf32>
    %176 = vector.broadcast %175 : vector<1x128xf32> to vector<8x128xf32>
    %177 = arith.addf %173, %176 : vector<8x128xf32>
    %c3 = arith.constant 3 : index
    %c0_52 = arith.constant 0 : index
    %c0_53 = arith.constant 0 : index
    %178 = vector.load %arg1[%c3, %c0_52, %c0_53] : memref<4x8x128xf32, #tpu.memory_space<vmem>>, vector<1x8x128xf32>
    %179 = vector.shape_cast %178 : vector<1x8x128xf32> to vector<8x128xf32>
    %c3_54 = arith.constant 3 : index
    %c0_55 = arith.constant 0 : index
    %c0_56 = arith.constant 0 : index
    %180 = vector.load %arg2[%c3_54, %c0_55, %c0_56] : memref<4x10x128xf32, #tpu.memory_space<vmem>>, vector<1x10x128xf32>
    %181 = vector.shape_cast %180 : vector<1x10x128xf32> to vector<10x128xf32>
    %182 = vector.extract_strided_slice %181 {offsets = [0, 0], sizes = [1, 128], strides = [1, 1]} : vector<10x128xf32> to vector<1x128xf32>
    %183 = vector.extract_strided_slice %181 {offsets = [1, 0], sizes = [1, 128], strides = [1, 1]} : vector<10x128xf32> to vector<1x128xf32>
    %184 = vector.extract_strided_slice %181 {offsets = [2, 0], sizes = [1, 128], strides = [1, 1]} : vector<10x128xf32> to vector<1x128xf32>
    %185 = vector.extract_strided_slice %181 {offsets = [3, 0], sizes = [1, 128], strides = [1, 1]} : vector<10x128xf32> to vector<1x128xf32>
    %186 = vector.extract_strided_slice %181 {offsets = [4, 0], sizes = [1, 128], strides = [1, 1]} : vector<10x128xf32> to vector<1x128xf32>
    %187 = vector.extract_strided_slice %181 {offsets = [5, 0], sizes = [1, 128], strides = [1, 1]} : vector<10x128xf32> to vector<1x128xf32>
    %188 = vector.extract_strided_slice %181 {offsets = [6, 0], sizes = [1, 128], strides = [1, 1]} : vector<10x128xf32> to vector<1x128xf32>
    %189 = vector.extract_strided_slice %181 {offsets = [7, 0], sizes = [1, 128], strides = [1, 1]} : vector<10x128xf32> to vector<1x128xf32>
    %190 = vector.extract_strided_slice %181 {offsets = [8, 0], sizes = [1, 128], strides = [1, 1]} : vector<10x128xf32> to vector<1x128xf32>
    %191 = vector.extract_strided_slice %181 {offsets = [9, 0], sizes = [1, 128], strides = [1, 1]} : vector<10x128xf32> to vector<1x128xf32>
    %192 = vector.broadcast %183 : vector<1x128xf32> to vector<8x128xf32>
    %193 = arith.mulf %192, %177 : vector<8x128xf32>
    %194 = vector.broadcast %184 : vector<1x128xf32> to vector<8x128xf32>
    %195 = arith.addf %193, %194 : vector<8x128xf32>
    %196 = arith.negf %195 : vector<8x128xf32>
    %197 = math.exp %196 : vector<8x128xf32>
    %cst_57 = arith.constant 1.000000e+00 : f32
    %198 = vector.broadcast %cst_57 : f32 to vector<8x128xf32>
    %199 = arith.addf %198, %197 : vector<8x128xf32>
    %200 = arith.divf %198, %199 : vector<8x128xf32>
    %201 = vector.broadcast %182 : vector<1x128xf32> to vector<8x128xf32>
    %202 = arith.mulf %201, %200 : vector<8x128xf32>
    %203 = vector.broadcast %185 : vector<1x128xf32> to vector<8x128xf32>
    %204 = arith.mulf %203, %177 : vector<8x128xf32>
    %205 = arith.addf %202, %204 : vector<8x128xf32>
    %206 = vector.broadcast %186 : vector<1x128xf32> to vector<8x128xf32>
    %207 = arith.addf %205, %206 : vector<8x128xf32>
    %208 = vector.broadcast %188 : vector<1x128xf32> to vector<8x128xf32>
    %209 = arith.mulf %208, %177 : vector<8x128xf32>
    %210 = vector.broadcast %189 : vector<1x128xf32> to vector<8x128xf32>
    %211 = arith.addf %209, %210 : vector<8x128xf32>
    %212 = arith.negf %211 : vector<8x128xf32>
    %213 = math.exp %212 : vector<8x128xf32>
    %cst_58 = arith.constant 1.000000e+00 : f32
    %214 = vector.broadcast %cst_58 : f32 to vector<8x128xf32>
    %215 = arith.addf %214, %213 : vector<8x128xf32>
    %216 = arith.divf %214, %215 : vector<8x128xf32>
    %217 = vector.broadcast %187 : vector<1x128xf32> to vector<8x128xf32>
    %218 = arith.mulf %217, %216 : vector<8x128xf32>
    %219 = vector.broadcast %190 : vector<1x128xf32> to vector<8x128xf32>
    %220 = arith.mulf %219, %177 : vector<8x128xf32>
    %221 = arith.addf %218, %220 : vector<8x128xf32>
    %222 = vector.broadcast %191 : vector<1x128xf32> to vector<8x128xf32>
    %223 = arith.addf %221, %222 : vector<8x128xf32>
    %224 = arith.subf %179, %207 : vector<8x128xf32>
    %225 = arith.mulf %224, %223 : vector<8x128xf32>
    %226 = arith.addf %225, %207 : vector<8x128xf32>
    %c3_59 = arith.constant 3 : index
    %c0_60 = arith.constant 0 : index
    %c0_61 = arith.constant 0 : index
    %227 = vector.load %arg5[%c3_59, %c0_60, %c0_61] : memref<4x8x128xf32, #tpu.memory_space<vmem>>, vector<1x8x128xf32>
    %228 = vector.shape_cast %227 : vector<1x8x128xf32> to vector<8x128xf32>
    %229 = vector.shape_cast %226 : vector<8x128xf32> to vector<1x8x128xf32>
    tpu.vector_store %arg5[%c3_59, %c0_60, %c0_61], %229 {strides = array<i32>} : memref<4x8x128xf32, #tpu.memory_space<vmem>>, vector<1x8x128xf32>,
    return
  }
}

</mosaic_0001>

<bundles_post_ra>
// kernel: decoder_forward.1
= control target key start
LH: loop header
LB: loop body
LE: loop exit
PB: predicated region body
PF: predicated region fallthrough
CT: control target
= control target key end

     0   :  { %v24_v0 = vlaneseq  ;;  %v848_v1 = vmov 0.0   ;;  %vm849_vm0 = vmmov 0   ;;  %s1220_s3 = inlined_call_operand.vmem [shape: f32[3,128,128], index: 3, kind: input, shape index: {}]   ;;  %s1221_s0 = inlined_call_operand.vmem [shape: f32[8,128], index: 0, kind: input, shape index: {}]   ;;  %s1222_s2 = inlined_call_operand.vmem [shape: f32[4,10,128], index: 2, kind: input, shape index: {}]   ;;  %s1223_s1 = inlined_call_operand.vmem [shape: f32[4,8,128], index: 1, kind: input, shape index: {}]   ;;  %s1224_s5 = inlined_call_operand.vmem [shape: f32[4,8,128], index: 5, kind: output, shape index: {}]   ;;  %s1225_s4 = inlined_call_operand.vmem [shape: f32[3,1,128], index: 4, kind: input, shape index: {}]  }
   0x1   :  { %709 = vmatprep.subr.mxu0 %v848_v1  ;;  %v107_v2 = vld [vmem:[%s1220_s3 + $0x78] sm:$0xff]  ;;  %v106_v3 = vld [vmem:[%s1220_s3 + $0x70] sm:$0xff]  ;;  %741 = vmatprep.mubr.msk.f32.mxu0 %vm849_vm0, %v848_v1  ;;  %v105_v5 = vld [vmem:[%s1220_s3 + $0x68] sm:$0xff] }
   0x2   :  { %710 = vmatpush3.msra.mxu0 %v107_v2  ;;  %v889_v4 = vshrl.u32 %v24_v0, 7  ;;  %744 = vmatprep.subr.mxu1 %v848_v1  ;;  %v104_v8 = vld [vmem:[%s1220_s3 + $0x60] sm:$0xff]  ;;  %v103_v11 = vld [vmem:[%s1220_s3 + $0x58] sm:$0xff]  ;;  %v102_v16 = vld [vmem:[%s1220_s3 + $0x50] sm:$0xff] }
   0x3   :  { %711 = vmatprep.subr.mxu0 %v848_v1  ;;  %776 = vmatprep.mubr.msk.f32.mxu1 %vm849_vm0, %v848_v1  ;;  %v921_v12 = vld [vmem:[%s1221_s0] sm:$0xff]  ;;  %v101_v20 = vld [vmem:[%s1220_s3 + $0x48] sm:$0xff]  ;;  %v99_v26 = vld [vmem:[%s1220_s3 + $0x38] sm:$0xff] }
   0x4   :  { %712 = vmatpush3.msra.mxu0 %v106_v3  ;;  %v899_v6 = vsub.s32 1, %v889_v4  ;;  %v902_v7 = vsub.s32 2, %v889_v4  ;;  %v909_v9 = vsub.s32 6, %v889_v4  ;;  %v912_v10 = vsub.s32 7, %v889_v4  ;;  %v926_v13 = vld [vmem:[%s1222_s2] sm:$0xff]  ;;  %v98_v28 = vld [vmem:[%s1220_s3 + $0x30] sm:$0xff] }
   0x5   :  { %713 = vmatprep.subr.mxu0 %v848_v1  ;;  %v100_v23 = vld [vmem:[%s1220_s3 + $0x40] sm:$0xff]  ;;  %v97_v29 = vld [vmem:[%s1220_s3 + $0x28] sm:$0xff]  ;;  %v95_v31 = vld [vmem:[%s1220_s3 + $0x18] sm:$0xff]  ;;  %v985_v39 = vsub.s32 3, %v889_v4  ;;  %v991_v41 = vsub.s32 0, %v889_v4  ;;  %v994_v42 = vsub.s32 5, %v889_v4 }
   0x6   :  { %714 = vmatpush3.msra.mxu0 %v105_v5  ;;  %v27_v14 = vrot.slane %v926_v13, %v899_v6  ;;  %v32_v15 = vrot.slane %v926_v13, %v902_v7  ;;  %v59_v17 = vrot.slane %v926_v13, %v909_v9  ;;  %v64_v18 = vrot.slane %v926_v13, %v912_v10  ;;  %v96_v30 = vld [vmem:[%s1220_s3 + $0x20] sm:$0xff]  ;;  %v94_v32 = vld [vmem:[%s1220_s3 + $0x10] sm:$0xff]  ;;  %v93_v33 = vld [vmem:[%s1220_s3 + $0x8] sm:$0xff] }
   0x7   :  { %715 = vmatprep.subr.mxu0 %v848_v1  ;;  %v92_v35 = vld [vmem:[%s1220_s3] sm:$0xff]  ;;  %v23_v40 = vld [vmem:[%s1222_s2 + $0x8] sm:$0x3]  ;;  %v48_v43 = vrot.slane %v926_v13, %v985_v39  ;;  %v43_v45 = vrot.slane %v926_v13, %v991_v41  ;;  %v1002_v46 = vsub.s32 4, %v889_v4  ;;  %v75_v47 = vrot.slane %v926_v13, %v994_v42  ;;  %v625_v0 = vld [vmem:[%s1220_s3 + $0xf8] sm:$0xff] }
   0x8   :  { %716 = vmatpush3.msra.mxu0 %v104_v8  ;;  %v28_v19 = vmul.f32 %v27_v14, %v921_v12  ;;  %v60_v21 = vmul.f32 %v59_v17, %v921_v12  ;;  %v80_v44 = vrot.slane %v23_v40, %v991_v41  ;;  %v86_v55 = vrot.slane %v23_v40, %v899_v6  ;;  %v21_v57 = vld [vmem:[%s1223_s1] sm:$0xff]  ;;  %v624_v2 = vld [vmem:[%s1220_s3 + $0xf0] sm:$0xff]  ;;  %v623_v3 = vld [vmem:[%s1220_s3 + $0xe8] sm:$0xff] }
   0x9   :  { %717 = vmatprep.subr.mxu0 %v848_v1  ;;  %v49_v48 = vmul.f32 %v48_v43, %v921_v12  ;;  %v54_v53 = vrot.slane %v926_v13, %v1002_v46  ;;  %745 = vmatpush3.msra.mxu1 %v625_v0  ;;  %v622_v4 = vld [vmem:[%s1220_s3 + $0xe0] sm:$0xff]  ;;  %v621_v5 = vld [vmem:[%s1220_s3 + $0xd8] sm:$0xff]  ;;  %v620_v8 = vld [vmem:[%s1220_s3 + $0xd0] sm:$0xff] }
   0xa   :  { %718 = vmatpush3.msra.mxu0 %v103_v11  ;;  %v33_v22 = vadd.f32 %v32_v15, %v28_v19  ;;  %v65_v24 = vadd.f32 %v64_v18, %v60_v21  ;;  %v81_v50 = vmul.f32 %v80_v44, %v921_v12  ;;  %746 = vmatprep.subr.mxu1 %v848_v1  ;;  %v619_v11 = vld [vmem:[%s1220_s3 + $0xc8] sm:$0xff]  ;;  %v618_v12 = vld [vmem:[%s1220_s3 + $0xc0] sm:$0xff]  ;;  %v617_v13 = vld [vmem:[%s1220_s3 + $0xb8] sm:$0xff] }
   0xb   :  { %719 = vmatprep.subr.mxu0 %v848_v1  ;;  %747 = vmatpush3.msra.mxu1 %v624_v2  ;;  %v616_v14 = vld [vmem:[%s1220_s3 + $0xb0] sm:$0xff]  ;;  %v615_v15 = vld [vmem:[%s1220_s3 + $0xa8] sm:$0xff]  ;;  %v613_v17 = vld [vmem:[%s1220_s3 + $0x98] sm:$0xff] }
   0xc   :  { %720 = vmatpush3.msra.mxu0 %v102_v16  ;;  %v601_v25 = vmul.f32 -1.442695, %v33_v22  ;;  %v602_v27 = vmul.f32 -1.442695, %v65_v24  ;;  %748 = vmatprep.subr.mxu1 %v848_v1  ;;  %v614_v16 = vld [vmem:[%s1220_s3 + $0xa0] sm:$0xff]  ;;  %v612_v18 = vld [vmem:[%s1220_s3 + $0x90] sm:$0xff] }
   0xd   :  { %721 = vmatprep.subr.mxu0 %v848_v1  ;;  %749 = vmatpush3.msra.mxu1 %v623_v3  ;;  %v611_v19 = vld [vmem:[%s1220_s3 + $0x88] sm:$0xff]  ;;  %v605_v21 = vld [vmem:[%s1222_s2 + $0x10] sm:$0xff]  ;;  %v603_v22 = vld [vmem:[%s1225_s4] ss:$0 sm:$0xff] }
   0xe   :  { %722 = vmatpush3.msra.mxu0 %v101_v20  ;;  %816 = vpow2.f32 %v601_v25  ;;  %750 = vmatprep.subr.mxu1 %v848_v1  ;;  %v610_v20 = vld [vmem:[%s1220_s3 + $0x80] sm:$0xff]  ;;  %v225_v24 = vrot.slane %v605_v21, %v909_v9  ;;  %v606_v43 = vld [vmem:[%s1222_s2 + $0x18] sm:$0x3]  ;;  %v214_v44 = vrot.slane %v605_v21, %v985_v39  ;;  %v648_v3 = vld [vmem:[%s1220_s3 + $0x170] sm:$0xff] }
   0xf   :  { %723 = vmatprep.subr.mxu0 %v848_v1  ;;  %818 = vpow2.f32 %v602_v27  ;;  %751 = vmatpush3.msra.mxu1 %v622_v4  ;;  %v198_v27 = vrot.slane %v605_v21, %v902_v7  ;;  %v649_v2 = vld [vmem:[%s1220_s3 + $0x178] sm:$0xff]  ;;  %v647_v4 = vld [vmem:[%s1220_s3 + $0x168] sm:$0xff] }
  0x10   :  { %724 = vmatpush3.msra.mxu0 %v100_v23  ;;  %752 = vmatprep.subr.mxu1 %v848_v1  ;;  %v193_v23 = vrot.slane %v605_v21, %v899_v6 }
  0x11   :  { %725 = vmatprep.subr.mxu0 %v848_v1  ;;  %753 = vmatpush3.msra.mxu1 %v621_v5  ;;  %v646_v5 = vld [vmem:[%s1220_s3 + $0x160] sm:$0xff] }
  0x12   :  { %726 = vmatpush3.msra.mxu0 %v99_v26  ;;  %754 = vmatprep.subr.mxu1 %v848_v1 }
  0x13   :  { %727 = vmatprep.subr.mxu0 %v848_v1  ;;  %755 = vmatpush3.msra.mxu1 %v620_v8  ;;  %v645_v8 = vld [vmem:[%s1220_s3 + $0x158] sm:$0xff] }
  0x14   :  { %728 = vmatpush3.msra.mxu0 %v98_v28  ;;  %756 = vmatprep.subr.mxu1 %v848_v1  ;;  %v230_v28 = vrot.slane %v605_v21, %v912_v10 }
  0x15   :  { %729 = vmatprep.subr.mxu0 %v848_v1  ;;  %757 = vmatpush3.msra.mxu1 %v619_v11  ;;  %v644_v11 = vld [vmem:[%s1220_s3 + $0x150] sm:$0xff] }
  0x16   :  { %730 = vmatpush3.msra.mxu0 %v97_v29  ;;  %758 = vmatprep.subr.mxu1 %v848_v1 }
  0x17   :  { %731 = vmatprep.subr.mxu0 %v848_v1  ;;  %759 = vmatpush3.msra.mxu1 %v618_v12  ;;  %v643_v12 = vld [vmem:[%s1220_s3 + $0x148] sm:$0xff] }
  0x18   :  { %732 = vmatpush3.msra.mxu0 %v96_v30  ;;  %760 = vmatprep.subr.mxu1 %v848_v1 }
  0x19   :  { %733 = vmatprep.subr.mxu0 %v848_v1  ;;  %761 = vmatpush3.msra.mxu1 %v617_v13  ;;  %v642_v13 = vld [vmem:[%s1220_s3 + $0x140] sm:$0xff] }
  0x1a   :  { %734 = vmatpush3.msra.mxu0 %v95_v31  ;;  %762 = vmatprep.subr.mxu1 %v848_v1 }
  0x1b   :  { %735 = vmatprep.subr.mxu0 %v848_v1  ;;  %v817_v34 = vpop.eup %816  ;;  %763 = vmatpush3.msra.mxu1 %v616_v14  ;;  %v641_v14 = vld [vmem:[%s1220_s3 + $0x138] sm:$0xff] }
  0x1c   :  { %736 = vmatpush3.msra.mxu0 %v94_v32  ;;  %v819_v36 = vpop.eup %818  ;;  %v37_v37 = vadd.f32 1.0, %v817_v34  ;;  %764 = vmatprep.subr.mxu1 %v848_v1 }
  0x1d   :  { %737 = vmatprep.subr.mxu0 %v848_v1  ;;  %v69_v38 = vadd.f32 1.0, %v819_v36  ;;  %765 = vmatpush3.msra.mxu1 %v615_v15  ;;  %v640_v15 = vld [vmem:[%s1220_s3 + $0x130] sm:$0xff] }
  0x1e   :  { %738 = vmatpush3.msra.mxu0 %v93_v33  ;;  %820 = vrcp.f32 %v37_v37  ;;  %766 = vmatprep.subr.mxu1 %v848_v1 }
  0x1f   :  { %739 = vmatprep.subr.mxu0 %v848_v1  ;;  %822 = vrcp.f32 %v69_v38  ;;  %767 = vmatpush3.msra.mxu1 %v614_v16  ;;  %v639_v16 = vld [vmem:[%s1220_s3 + $0x128] sm:$0xff] }
  0x20   :  { %740 = vmatpush3.msra.mxu0 %v92_v35  ;;  %768 = vmatprep.subr.mxu1 %v848_v1 }
  0x21   :  { %779 = vmatprep.subr.mxu0 %v848_v1  ;;  %769 = vmatpush3.msra.mxu1 %v613_v17  ;;  %v638_v17 = vld [vmem:[%s1220_s3 + $0x120] sm:$0xff] }
  0x22   :  { %770 = vmatprep.subr.mxu1 %v848_v1 }
  0x23   :  { %771 = vmatpush3.msra.mxu1 %v612_v18  ;;  %v637_v18 = vld [vmem:[%s1220_s3 + $0x118] sm:$0xff] }
  0x24   :  { %772 = vmatprep.subr.mxu1 %v848_v1 }
  0x25   :  { %773 = vmatpush3.msra.mxu1 %v611_v19  ;;  %v636_v19 = vld [vmem:[%s1220_s3 + $0x110] sm:$0xff] }
  0x26   :  { %774 = vmatprep.subr.mxu1 %v848_v1 }
  0x27   :  { %775 = vmatpush3.msra.mxu1 %v610_v20  ;;  %v635_v20 = vld [vmem:[%s1220_s3 + $0x108] sm:$0xff] }
  0x2b   :  { %v821_v49 = vpop.eup %820 }
  0x2c   :  { %v823_v51 = vpop.eup %822  ;;  %v44_v52 = vmul.f32 %v821_v49, %v43_v45  ;;  %v209_v45 = vrot.slane %v605_v21, %v991_v41 }
  0x2d   :  { %v76_v54 = vmul.f32 %v823_v51, %v75_v47  ;;  %v246_v47 = vrot.slane %v606_v43, %v991_v41 }
  0x2e   :  { %v50_v56 = vadd.f32 %v49_v48, %v44_v52  ;;  %v241_v48 = vrot.slane %v605_v21, %v994_v42 }
  0x2f   :  { %v82_v58 = vadd.f32 %v81_v50, %v76_v54 }
  0x30   :  { %v55_v59 = vadd.f32 %v54_v53, %v50_v56  ;;  %v220_v53 = vrot.slane %v605_v21, %v1002_v46  ;;  %v634_v21 = vld [vmem:[%s1220_s3 + $0x100] sm:$0xff] }
  0x31   :  { %v87_v60 = vadd.f32 %v86_v55, %v82_v58  ;;  %v604_v58 = vld [vmem:[%s1223_s1 + $0x8] sm:$0xff] }
  0x32   :  { %v88_v61 = vsub.f32 %v21_v57, %v55_v59  ;;  %v252_v57 = vrot.slane %v606_v43, %v899_v6  ;;  %v630_v43 = vld [vmem:[%s1222_s2 + $0x28] sm:$0x3] }
  0x34   :  { %v89_v62 = vmul.f32 %v88_v61, %v87_v60 }
  0x36   :  { %v90_v63 = vadd.f32 %v89_v62, %v55_v59 }
  0x38   :  { %91 = vst [vmem:[%s1224_s5] sm:$0xff] %v90_v63  ;;  %742 = vmatmul.mubr.f32.vlgmr.msra.gmra.mxu0 %v90_v63 }
  0x39   :  { %811 = vmatprep.mubr.msk.f32.mxu0 %vm849_vm0, %v848_v1  ;;  %780 = vmatpush3.msra.mxu0 %v649_v2  ;;  %v653_v2 = vld [vmem:[%s1222_s2 + $0x30] sm:$0xff] }
  0x3a   :  { %781 = vmatprep.subr.mxu0 %v848_v1 }
  0x3b   :  { %782 = vmatpush3.msra.mxu0 %v648_v3  ;;  %v651_v3 = vld [vmem:[%s1225_s4 + $0x2] ss:$0 sm:$0xff] }
  0x3c   :  { %783 = vmatprep.subr.mxu0 %v848_v1 }
  0x3d   :  { %784 = vmatpush3.msra.mxu0 %v647_v4  ;;  %v531_v4 = vrot.slane %v653_v2, %v899_v6 }
  0x3e   :  { %785 = vmatprep.subr.mxu0 %v848_v1 }
  0x3f   :  { %786 = vmatpush3.msra.mxu0 %v646_v5  ;;  %v563_v5 = vrot.slane %v653_v2, %v909_v9 }
  0x40   :  { %787 = vmatprep.subr.mxu0 %v848_v1 }
  0x41   :  { %788 = vmatpush3.msra.mxu0 %v645_v8 }
  0x42   :  { %789 = vmatprep.subr.mxu0 %v848_v1 }
  0x43   :  { %790 = vmatpush3.msra.mxu0 %v644_v11 }
  0x44   :  { %791 = vmatprep.subr.mxu0 %v848_v1 }
  0x45   :  { %792 = vmatpush3.msra.mxu0 %v643_v12  ;;  %v536_v12 = vrot.slane %v653_v2, %v902_v7 }
  0x46   :  { %793 = vmatprep.subr.mxu0 %v848_v1 }
  0x47   :  { %794 = vmatpush3.msra.mxu0 %v642_v13  ;;  %v568_v13 = vrot.slane %v653_v2, %v912_v10 }
  0x48   :  { %795 = vmatprep.subr.mxu0 %v848_v1 }
  0x49   :  { %796 = vmatpush3.msra.mxu0 %v641_v14 }
  0x4a   :  { %797 = vmatprep.subr.mxu0 %v848_v1 }
  0x4b   :  { %798 = vmatpush3.msra.mxu0 %v640_v15 }
  0x4c   :  { %799 = vmatprep.subr.mxu0 %v848_v1 }
  0x4d   :  { %800 = vmatpush3.msra.mxu0 %v639_v16 }
  0x4e   :  { %801 = vmatprep.subr.mxu0 %v848_v1 }
  0x4f   :  { %802 = vmatpush3.msra.mxu0 %v638_v17 }
  0x50   :  { %803 = vmatprep.subr.mxu0 %v848_v1 }
  0x51   :  { %804 = vmatpush3.msra.mxu0 %v637_v18 }
  0x52   :  { %805 = vmatprep.subr.mxu0 %v848_v1 }
  0x53   :  { %806 = vmatpush3.msra.mxu0 %v636_v19 }
  0x54   :  { %807 = vmatprep.subr.mxu0 %v848_v1 }
  0x55   :  { %808 = vmatpush3.msra.mxu0 %v635_v20 }
  0x56   :  { %809 = vmatprep.subr.mxu0 %v848_v1 }
  0x57   :  { %810 = vmatpush3.msra.mxu0 %v634_v21 }
  0xf8   :  { %v181_v25 = vpop.f32.mrf.mxu0 }
  0xf9   :  { %v182_v26 = vadd.f32 %v603_v22, %v181_v25  ;;  %v629_v22 = vld [vmem:[%s1222_s2 + $0x20] sm:$0xff] }
  0xfa   :  { %v743_v29 = vpop.f32.mrf.mxu0  ;;  %v394_v25 = vrot.slane %v629_v22, %v909_v9  ;;  %v547_v9 = vrot.slane %v653_v2, %v991_v41 }
  0xfb   :  { %v194_v30 = vmul.f32 %v193_v23, %v182_v26  ;;  %v226_v31 = vmul.f32 %v225_v24, %v182_v26  ;;  %v215_v51 = vmul.f32 %v214_v44, %v182_v26  ;;  %v247_v54 = vmul.f32 %v246_v47, %v182_v26  ;;  %v627_v23 = vld [vmem:[%s1225_s4 + $0x1] ss:$0 sm:$0xff] }
  0xfc   :  { %v362_v24 = vrot.slane %v629_v22, %v899_v6  ;;  %v399_v29 = vrot.slane %v629_v22, %v912_v10  ;;  %v378_v44 = vrot.slane %v629_v22, %v991_v41  ;;  %v410_v47 = vrot.slane %v629_v22, %v994_v42 }
  0xfd   :  { %v199_v32 = vadd.f32 %v198_v27, %v194_v30  ;;  %v231_v33 = vadd.f32 %v230_v28, %v226_v31  ;;  %v367_v28 = vrot.slane %v629_v22, %v902_v7  ;;  %v654_v7 = vld [vmem:[%s1222_s2 + $0x38] sm:$0x3]  ;;  %v552_v10 = vrot.slane %v653_v2, %v985_v39 }
  0xff   :  { %v607_v34 = vmul.f32 -1.442695, %v199_v32  ;;  %v608_v35 = vmul.f32 -1.442695, %v231_v33 }
 0x101   :  { %824 = vpow2.f32 %v607_v34 }
 0x102   :  { %826 = vpow2.f32 %v608_v35 }
 0x10e   :  { %v825_v36 = vpop.eup %824 }
 0x10f   :  { %v827_v37 = vpop.eup %826  ;;  %v203_v38 = vadd.f32 1.0, %v825_v36 }
 0x110   :  { %v235_v40 = vadd.f32 1.0, %v827_v37 }
 0x111   :  { %828 = vrcp.f32 %v203_v38 }
 0x112   :  { %830 = vrcp.f32 %v235_v40 }
 0x11e   :  { %v829_v49 = vpop.eup %828 }
 0x11f   :  { %v831_v50 = vpop.eup %830  ;;  %v210_v52 = vmul.f32 %v829_v49, %v209_v45  ;;  %v383_v45 = vrot.slane %v629_v22, %v985_v39 }
 0x120   :  { %v242_v55 = vmul.f32 %v831_v50, %v241_v48  ;;  %v415_v48 = vrot.slane %v630_v43, %v991_v41 }
 0x121   :  { %v216_v56 = vadd.f32 %v215_v51, %v210_v52 }
 0x122   :  { %v248_v59 = vadd.f32 %v247_v54, %v242_v55 }
 0x123   :  { %v221_v60 = vadd.f32 %v220_v53, %v216_v56  ;;  %v389_v53 = vrot.slane %v629_v22, %v1002_v46 }
 0x124   :  { %v253_v61 = vadd.f32 %v252_v57, %v248_v59  ;;  %v421_v57 = vrot.slane %v630_v43, %v899_v6  ;;  %v628_v59 = vld [vmem:[%s1223_s1 + $0x10] sm:$0xff] }
 0x125   :  { %v254_v62 = vsub.f32 %v604_v58, %v221_v60 }
 0x127   :  { %v255_v63 = vmul.f32 %v254_v62, %v253_v61 }
 0x129   :  { %v256_v0 = vadd.f32 %v255_v63, %v221_v60 }
 0x12b   :  { %609 = vst [vmem:[%s1224_s5 + $0x8] sm:$0xff] %v256_v0  ;;  %777 = vmatmul.mubr.f32.vlgmr.msra.gmra.mxu1 %v256_v0 }
 0x1eb   :  { %v350_v26 = vpop.f32.mrf.mxu1 }
 0x1ec   :  { %v351_v27 = vadd.f32 %v627_v23, %v350_v26  ;;  %v584_v26 = vrot.slane %v654_v7, %v991_v41 }
 0x1ed   :  { %v778_v1 = vpop.f32.mrf.mxu1 }
 0x1ee   :  { %v363_v30 = vmul.f32 %v362_v24, %v351_v27  ;;  %v395_v31 = vmul.f32 %v394_v25, %v351_v27  ;;  %v384_v52 = vmul.f32 %v383_v45, %v351_v27  ;;  %v416_v55 = vmul.f32 %v415_v48, %v351_v27 }
 0x1ef   :  { %v579_v25 = vrot.slane %v653_v2, %v994_v42 }
 0x1f0   :  { %v368_v32 = vadd.f32 %v367_v28, %v363_v30  ;;  %v400_v33 = vadd.f32 %v399_v29, %v395_v31  ;;  %v558_v30 = vrot.slane %v653_v2, %v1002_v46 }
 0x1f2   :  { %v631_v34 = vmul.f32 -1.442695, %v368_v32  ;;  %v632_v35 = vmul.f32 -1.442695, %v400_v33 }
 0x1f4   :  { %832 = vpow2.f32 %v631_v34  ;;  %v590_v34 = vrot.slane %v654_v7, %v899_v6 }
 0x1f5   :  { %834 = vpow2.f32 %v632_v35  ;;  %v652_v35 = vld [vmem:[%s1223_s1 + $0x18] sm:$0xff] }
 0x201   :  { %v833_v36 = vpop.eup %832 }
 0x202   :  { %v835_v37 = vpop.eup %834  ;;  %v372_v38 = vadd.f32 1.0, %v833_v36 }
 0x203   :  { %v404_v40 = vadd.f32 1.0, %v835_v37 }
 0x204   :  { %836 = vrcp.f32 %v372_v38 }
 0x205   :  { %838 = vrcp.f32 %v404_v40 }
 0x211   :  { %v837_v49 = vpop.eup %836 }
 0x212   :  { %v839_v50 = vpop.eup %838  ;;  %v379_v51 = vmul.f32 %v837_v49, %v378_v44 }
 0x213   :  { %v411_v54 = vmul.f32 %v839_v50, %v410_v47 }
 0x214   :  { %v385_v56 = vadd.f32 %v384_v52, %v379_v51 }
 0x215   :  { %v417_v58 = vadd.f32 %v416_v55, %v411_v54 }
 0x216   :  { %v390_v60 = vadd.f32 %v389_v53, %v385_v56 }
 0x217   :  { %v422_v61 = vadd.f32 %v421_v57, %v417_v58 }
 0x218   :  { %v423_v62 = vsub.f32 %v628_v59, %v390_v60 }
 0x21a   :  { %v424_v63 = vmul.f32 %v423_v62, %v422_v61 }
 0x21c   :  { %v425_v0 = vadd.f32 %v424_v63, %v390_v60 }
 0x21e   :  { %633 = vst [vmem:[%s1224_s5 + $0x10] sm:$0xff] %v425_v0  ;;  %812 = vmatmul.mubr.f32.vlgmr.msra.gmra.mxu0 %v425_v0 }
 0x2de   :  { %v519_v8 = vpop.f32.mrf.mxu0 }
 0x2df   :  { %v520_v11 = vadd.f32 %v651_v3, %v519_v8 }
 0x2e0   :  { %v813_v14 = vpop.f32.mrf.mxu0 }
 0x2e1   :  { %v532_v15 = vmul.f32 %v531_v4, %v520_v11  ;;  %v564_v16 = vmul.f32 %v563_v5, %v520_v11  ;;  %v553_v1 = vmul.f32 %v552_v10, %v520_v11  ;;  %v585_v32 = vmul.f32 %v584_v26, %v520_v11 }
 0x2e3   :  { %v537_v17 = vadd.f32 %v536_v12, %v532_v15  ;;  %v569_v18 = vadd.f32 %v568_v13, %v564_v16 }
 0x2e5   :  { %v655_v19 = vmul.f32 -1.442695, %v537_v17  ;;  %v656_v20 = vmul.f32 -1.442695, %v569_v18 }
 0x2e7   :  { %840 = vpow2.f32 %v655_v19 }
 0x2e8   :  { %842 = vpow2.f32 %v656_v20 }
 0x2f4   :  { %v841_v21 = vpop.eup %840 }
 0x2f5   :  { %v843_v22 = vpop.eup %842  ;;  %v541_v23 = vadd.f32 1.0, %v841_v21 }
 0x2f6   :  { %v573_v24 = vadd.f32 1.0, %v843_v22 }
 0x2f7   :  { %844 = vrcp.f32 %v541_v23 }
 0x2f8   :  { %846 = vrcp.f32 %v573_v24 }
 0x304   :  { %v845_v27 = vpop.eup %844 }
 0x305   :  { %v847_v28 = vpop.eup %846  ;;  %v548_v29 = vmul.f32 %v845_v27, %v547_v9 }
 0x306   :  { %v580_v31 = vmul.f32 %v847_v28, %v579_v25 }
 0x307   :  { %v554_v33 = vadd.f32 %v553_v1, %v548_v29 }
 0x308   :  { %v586_v39 = vadd.f32 %v585_v32, %v580_v31 }
 0x309   :  { %v559_v36 = vadd.f32 %v558_v30, %v554_v33 }
 0x30a   :  { %v591_v42 = vadd.f32 %v590_v34, %v586_v39 }
 0x30b   :  { %v592_v37 = vsub.f32 %v652_v35, %v559_v36 }
 0x30d   :  { %v593_v41 = vmul.f32 %v592_v37, %v591_v42 }
 0x30f   :  { %v594_v38 = vadd.f32 %v593_v41, %v559_v36 }
 0x311   :  { %657 = vst [vmem:[%s1224_s5 + $0x18] sm:$0xff] %v594_v38 }

</bundles_post_ra>
